<compile_context>
chip_gen: v7x
topology: tpu7x:2x2x1
jax: 0.10.0
libtpu: 0.0.40
codegen_flags: <defaults>
</compile_context>

<pallas_src>
import math

import jax
import jax.numpy as jnp
from jax.experimental import pallas as pl
from jax.experimental.pallas import tpu as pltpu


def _mlp_kernel(x_ref, w1_ref, b1_ref, w2_ref, b2_ref, w3_ref, b3_ref, o_ref):
    # Layer 1: (TB, D) @ (D, 64) on the MXU, bf16 operands, f32 accumulation.
    x = x_ref[...].astype(jnp.bfloat16)
    h1 = jnp.dot(x, w1_ref[...].astype(jnp.bfloat16),
                 preferred_element_type=jnp.float32)
    h1 = jnp.maximum(h1 + b1_ref[...], 0.0)          # bias + ReLU in f32
    # (dropout p=0.3 is identity in eval mode)

    # Layer 2: (TB, 64) @ (64, 32) on the MXU.
    h2 = jnp.dot(h1.astype(jnp.bfloat16), w2_ref[...].astype(jnp.bfloat16),
                 preferred_element_type=jnp.float32)
    h2 = jnp.maximum(h2 + b2_ref[...], 0.0)

    # Layer 3: output width 1 -> VPU multiply + lane reduction instead of a
    # 1-wide MXU matmul; sigmoid runs on the EUP.  All f32.
    logits = jnp.sum(h2 * w3_ref[...], axis=-1, keepdims=True) + b3_ref[...]
    o_ref[...] = jax.nn.sigmoid(logits)


def _round_up(n, m):
    return ((n + m - 1) // m) * m


def spam_classifier_forward(x, params, *, block_batch=4096):
    """x: (B, input_dim) float32. params: w1,b1,w2,b2,w3,b3 in (fan_in, fan_out) layout.

    Returns (B, 1) float32 probabilities, matching SpamClassifier.forward in eval mode.
    """
    B, D = x.shape

    # Minimal batch padding: only to the f32 sublane granularity (8 rows).
    b8 = _round_up(max(B, 8), 8)

    # Grid sizing: big tiles to amortize the ~0.35us/step overhead; keep an
    # even step count >= 2 for moderate batches so both v7x TCs get work.
    n_steps = pl.cdiv(b8, block_batch)
    if b8 >= 1024:
        n_steps = max(n_steps, 2)
        if n_steps % 2:
            n_steps += 1
    tb = _round_up(pl.cdiv(b8, n_steps), 8)
    b_pad = n_steps * tb                      # over-padding < 8 rows per step

    xp = x if b_pad == B else jnp.pad(x, ((0, b_pad - B), (0, 0)))

    w1 = params["w1"]                         # (D, 64) f32; cast in-kernel
    w2 = params["w2"]                         # (64, 32)
    w3_row = params["w3"].reshape(1, -1)      # (1, 32) row for the VPU reduce
    b1 = params["b1"].reshape(1, -1)          # (1, 64)
    b2 = params["b2"].reshape(1, -1)          # (1, 32)
    b3 = params["b3"].reshape(1, 1)           # (1, 1)

    const = lambda i: (0, 0)  # weights/biases: fetched once, stay resident in VMEM

    out = pl.pallas_call(
        _mlp_kernel,
        out_shape=jax.ShapeDtypeStruct((b_pad, 1), jnp.float32),
        grid=(n_steps,),
        in_specs=[
            pl.BlockSpec((tb, D), lambda i: (i, 0)),   # x: batch-tiled, pipelined
            pl.BlockSpec(w1.shape, const),
            pl.BlockSpec(b1.shape, const),
            pl.BlockSpec(w2.shape, const),
            pl.BlockSpec(b2.shape, const),
            pl.BlockSpec(w3_row.shape, const),
            pl.BlockSpec(b3.shape, const),
        ],
        out_specs=pl.BlockSpec((tb, 1), lambda i: (i, 0)),
        compiler_params=pltpu.CompilerParams(
            dimension_semantics=("parallel",),         # shard batch steps over v7x TCs
        ),
    )(xp, w1, b1, w2, b2, w3_row, b3)

    # Drop the (tiny) batch padding; output is already (B, 1).
    return out[:B]


def init_params(key, input_dim):
    """Deterministic PyTorch-style Linear init: U(-1/sqrt(fan_in), 1/sqrt(fan_in)).

    Weights stored as (fan_in, fan_out); biases as (1, fan_out)."""
    dims = [(input_dim, 64), (64, 32), (32, 1)]
    params = {}
    for i, (fan_in, fan_out) in enumerate(dims, start=1):
        key, kw, kb = jax.random.split(key, 3)
        bound = 1.0 / math.sqrt(fan_in)
        params[f"w{i}"] = jax.random.uniform(
            kw, (fan_in, fan_out), jnp.float32, -bound, bound)
        params[f"b{i}"] = jax.random.uniform(
            kb, (1, fan_out), jnp.float32, -bound, bound)
    return params


if __name__ == "__main__":
    key = jax.random.PRNGKey(0)
    key, kx = jax.random.split(key)

    batch = 8
    input_dim = 32

    x = jax.random.normal(kx, (batch, input_dim), dtype=jnp.float32)
    params = init_params(key, input_dim)

    out = jax.block_until_ready(spam_classifier_forward(x, params))
    assert out.shape == (batch, 1)

    # Reference 1: mirrors the kernel's mixed precision exactly (tight check).
    def ref_mixed(x, p):
        bf = lambda a: a.astype(jnp.bfloat16)
        h1 = jnp.maximum(
            jnp.dot(bf(x), bf(p["w1"]), preferred_element_type=jnp.float32) + p["b1"], 0.0)
        h2 = jnp.maximum(
            jnp.dot(bf(h1), bf(p["w2"]), preferred_element_type=jnp.float32) + p["b2"], 0.0)
        return jax.nn.sigmoid(h2 @ p["w3"] + p["b3"])

    # Reference 2: pure fp32 forward (semantics of the original module, eval mode).
    def ref_f32(x, p):
        h1 = jnp.maximum(x @ p["w1"] + p["b1"], 0.0)
        h2 = jnp.maximum(h1 @ p["w2"] + p["b2"], 0.0)
        return jax.nn.sigmoid(h2 @ p["w3"] + p["b3"])

    assert jnp.allclose(out, ref_mixed(x, params), atol=1e-2, rtol=1e-2)
    assert jnp.allclose(out, ref_f32(x, params), atol=3e-2, rtol=3e-2)

    print("KERNEL_OK")
</pallas_src>

<mosaic_0001>
module attributes {stable_mosaic.version = 11 : i64} {
  func.func @_mlp_kernel(%arg0: i32, %arg1: memref<8x32xf32, #tpu.memory_space<vmem>>, %arg2: memref<32x64xf32, #tpu.memory_space<vmem>>, %arg3: memref<1x64xf32, #tpu.memory_space<vmem>>, %arg4: memref<64x32xf32, #tpu.memory_space<vmem>>, %arg5: memref<1x32xf32, #tpu.memory_space<vmem>>, %arg6: memref<1x32xf32, #tpu.memory_space<vmem>>, %arg7: memref<1x1xf32, #tpu.memory_space<vmem>>, %arg8: memref<8x1xf32, #tpu.memory_space<vmem>>) attributes {dimension_semantics = [#tpu.dimension_semantics<parallel>], iteration_bounds = array<i64: 1>, scalar_prefetch = 0 : i64, scratch_operands = 0 : i64, tpu.core_type = #tpu.core_type<tc>, window_params = [{transform_indices = @transform_0, window_bounds = array<i64: 8, 32>}, {pipeline_mode = #tpu.pipeline_mode<synchronous>, transform_indices = @transform_1, window_bounds = array<i64: 32, 64>}, {pipeline_mode = #tpu.pipeline_mode<synchronous>, transform_indices = @transform_2, window_bounds = array<i64: 1, 64>}, {pipeline_mode = #tpu.pipeline_mode<synchronous>, transform_indices = @transform_3, window_bounds = array<i64: 64, 32>}, {pipeline_mode = #tpu.pipeline_mode<synchronous>, transform_indices = @transform_4, window_bounds = array<i64: 1, 32>}, {pipeline_mode = #tpu.pipeline_mode<synchronous>, transform_indices = @transform_5, window_bounds = array<i64: 1, 32>}, {pipeline_mode = #tpu.pipeline_mode<synchronous>, transform_indices = @transform_6, window_bounds = array<i64: 1, 1>}, {transform_indices = @transform_7, window_bounds = array<i64: 8, 1>}]} {
    %c0 = arith.constant 0 : index
    %c0_0 = arith.constant 0 : index
    %0 = vector.load %arg1[%c0, %c0_0] : memref<8x32xf32, #tpu.memory_space<vmem>>, vector<8x32xf32>
    %1 = arith.truncf %0 : vector<8x32xf32> to vector<8x32xbf16>
    %c0_1 = arith.constant 0 : index
    %c0_2 = arith.constant 0 : index
    %2 = vector.load %arg2[%c0_1, %c0_2] : memref<32x64xf32, #tpu.memory_space<vmem>>, vector<32x64xf32>
    %3 = arith.truncf %2 : vector<32x64xf32> to vector<32x64xbf16>
    %cst = arith.constant dense<0.000000e+00> : vector<8x64xf32>
    %4 = tpu.matmul %1, %3, %cst {dimension_numbers = #tpu.dot_dimension_numbers<[1], [0], [0], [1], [0, 0, 1, 1], [], []>} : vector<8x32xbf16>, vector<32x64xbf16>, vector<8x64xf32> -> vector<8x64xf32>
    %c0_3 = arith.constant 0 : index
    %c0_4 = arith.constant 0 : index
    %5 = vector.load %arg3[%c0_3, %c0_4] : memref<1x64xf32, #tpu.memory_space<vmem>>, vector<1x64xf32>
    %6 = vector.broadcast %5 : vector<1x64xf32> to vector<8x64xf32>
    %7 = arith.addf %4, %6 : vector<8x64xf32>
    %cst_5 = arith.constant 0.000000e+00 : f32
    %8 = vector.broadcast %cst_5 : f32 to vector<8x64xf32>
    %9 = arith.maximumf %7, %8 : vector<8x64xf32>
    %10 = arith.truncf %9 : vector<8x64xf32> to vector<8x64xbf16>
    %c0_6 = arith.constant 0 : index
    %c0_7 = arith.constant 0 : index
    %11 = vector.load %arg4[%c0_6, %c0_7] : memref<64x32xf32, #tpu.memory_space<vmem>>, vector<64x32xf32>
    %12 = arith.truncf %11 : vector<64x32xf32> to vector<64x32xbf16>
    %cst_8 = arith.constant dense<0.000000e+00> : vector<8x32xf32>
    %13 = tpu.matmul %10, %12, %cst_8 {dimension_numbers = #tpu.dot_dimension_numbers<[1], [0], [0], [1], [0, 0, 1, 1], [], []>} : vector<8x64xbf16>, vector<64x32xbf16>, vector<8x32xf32> -> vector<8x32xf32>
    %c0_9 = arith.constant 0 : index
    %c0_10 = arith.constant 0 : index
    %14 = vector.load %arg5[%c0_9, %c0_10] : memref<1x32xf32, #tpu.memory_space<vmem>>, vector<1x32xf32>
    %15 = vector.broadcast %14 : vector<1x32xf32> to vector<8x32xf32>
    %16 = arith.addf %13, %15 : vector<8x32xf32>
    %cst_11 = arith.constant 0.000000e+00 : f32
    %17 = vector.broadcast %cst_11 : f32 to vector<8x32xf32>
    %18 = arith.maximumf %16, %17 : vector<8x32xf32>
    %c0_12 = arith.constant 0 : index
    %c0_13 = arith.constant 0 : index
    %19 = vector.load %arg6[%c0_12, %c0_13] : memref<1x32xf32, #tpu.memory_space<vmem>>, vector<1x32xf32>
    %20 = vector.broadcast %19 : vector<1x32xf32> to vector<8x32xf32>
    %21 = arith.mulf %18, %20 : vector<8x32xf32>
    %cst_14 = arith.constant dense<0.000000e+00> : vector<8xf32>
    %22 = vector.multi_reduction <add>, %21, %cst_14 [1] : vector<8x32xf32> to vector<8xf32>
    %23 = vector.shape_cast %22 : vector<8xf32> to vector<8x1xf32>
    %c0_15 = arith.constant 0 : index
    %c0_16 = arith.constant 0 : index
    %24 = vector.load %arg7[%c0_15, %c0_16] : memref<1x1xf32, #tpu.memory_space<vmem>>, vector<1x1xf32>
    %25 = vector.broadcast %24 : vector<1x1xf32> to vector<8x1xf32>
    %26 = arith.addf %23, %25 : vector<8x1xf32>
    %27 = arith.negf %26 : vector<8x1xf32>
    %28 = math.exp %27 : vector<8x1xf32>
    %cst_17 = arith.constant 1.000000e+00 : f32
    %29 = vector.broadcast %cst_17 : f32 to vector<8x1xf32>
    %30 = arith.addf %29, %28 : vector<8x1xf32>
    %31 = arith.divf %29, %30 : vector<8x1xf32>
    %c0_18 = arith.constant 0 : index
    %c0_19 = arith.constant 0 : index
    %32 = vector.load %arg8[%c0_18, %c0_19] : memref<8x1xf32, #tpu.memory_space<vmem>>, vector<8x1xf32>
    tpu.vector_store %arg8[%c0_18, %c0_19], %31 {strides = array<i32>} : memref<8x1xf32, #tpu.memory_space<vmem>>, vector<8x1xf32>,
    return
  }
  func.func @transform_0(%arg0: i32) -> (i32, i32) {
    %c0_i32 = arith.constant 0 : i32
    %c0_i32_0 = arith.constant 0 : i32
    return %arg0, %c0_i32 : i32, i32
  }
  func.func @transform_1(%arg0: i32) -> (i32, i32) {
    %c0_i32 = arith.constant 0 : i32
    %c0_i32_0 = arith.constant 0 : i32
    %c0_i32_1 = arith.constant 0 : i32
    return %c0_i32, %c0_i32_0 : i32, i32
  }
  func.func @transform_2(%arg0: i32) -> (i32, i32) {
    %c0_i32 = arith.constant 0 : i32
    %c0_i32_0 = arith.constant 0 : i32
    %c0_i32_1 = arith.constant 0 : i32
    return %c0_i32, %c0_i32_0 : i32, i32
  }
  func.func @transform_3(%arg0: i32) -> (i32, i32) {
    %c0_i32 = arith.constant 0 : i32
    %c0_i32_0 = arith.constant 0 : i32
    %c0_i32_1 = arith.constant 0 : i32
    return %c0_i32, %c0_i32_0 : i32, i32
  }
  func.func @transform_4(%arg0: i32) -> (i32, i32) {
    %c0_i32 = arith.constant 0 : i32
    %c0_i32_0 = arith.constant 0 : i32
    %c0_i32_1 = arith.constant 0 : i32
    return %c0_i32, %c0_i32_0 : i32, i32
  }
  func.func @transform_5(%arg0: i32) -> (i32, i32) {
    %c0_i32 = arith.constant 0 : i32
    %c0_i32_0 = arith.constant 0 : i32
    %c0_i32_1 = arith.constant 0 : i32
    return %c0_i32, %c0_i32_0 : i32, i32
  }
  func.func @transform_6(%arg0: i32) -> (i32, i32) {
    %c0_i32 = arith.constant 0 : i32
    %c0_i32_0 = arith.constant 0 : i32
    %c0_i32_1 = arith.constant 0 : i32
    return %c0_i32, %c0_i32_0 : i32, i32
  }
  func.func @transform_7(%arg0: i32) -> (i32, i32) {
    %c0_i32 = arith.constant 0 : i32
    %c0_i32_0 = arith.constant 0 : i32
    return %arg0, %c0_i32 : i32, i32
  }
}

</mosaic_0001>

<bundles_post_ra>
// kernel: tpu_custom_call.1
= control target key start
LH: loop header
LB: loop body
LE: loop exit
PB: predicated region body
PF: predicated region fallthrough
CT: control target
= control target key end

     0   :  { %v226_v0 = vmov 0.0   ;;  %vm227_vm0 = vmmov 0   ;;  %vm44_vm1 = vcmask 261120   ;;  %vm109_vm2 = vcmask 523264   ;;  %s324_s1 = inlined_call_operand.vmem [shape: f32[32,64], index: 1, kind: input, shape index: {}]   ;;  %s325_s3 = inlined_call_operand.vmem [shape: f32[64,32], index: 3, kind: input, shape index: {}]   ;;  %s326_s0 = inlined_call_operand.vmem [shape: f32[8,32], index: 0, kind: input, shape index: {}]   ;;  %s327_s2 = inlined_call_operand.vmem [shape: f32[1,64], index: 2, kind: input, shape index: {}]   ;;  %s328_s6 = inlined_call_operand.<no memory space> [shape: f32[1,1], index: 6, kind: input, shape index: {}]   ;;  %s329_s4 = inlined_call_operand.vmem [shape: f32[1,32], index: 4, kind: input, shape index: {}]   ;;  %s330_s5 = inlined_call_operand.vmem [shape: f32[1,32], index: 5, kind: input, shape index: {}]   ;;  %s331_s7 = inlined_call_operand.vmem [shape: f32[8,1], index: 7, kind: output, shape index: {}]  }
   0x1   :  { %200 = vmatprep.subr.bf16.mxu0 %v226_v0  ;;  %v31_v1 = vld [vmem:[%s324_s1] sm:$0xff]  ;;  %v32_v2 = vld [vmem:[%s324_s1 + $0x8] sm:$0xff]  ;;  %v33_v3 = vld [vmem:[%s324_s1 + $0x10] sm:$0xff]  ;;  %204 = vmatprep.mubr.msk.bf16.mxu0 %vm227_vm0, %v226_v0  ;;  %v12_v29 = vstv %s328_s6  ;;  %vm179_vm3 = vcmask 7168  }
   0x2   :  { %v35_v4 = vpack.c.bf16 %v32_v2, %v31_v1  ;;  %v34_v5 = vld [vmem:[%s324_s1 + $0x18] sm:$0xff]  ;;  %208 = vmatprep.subr.bf16.mxu1 %v226_v0  ;;  %v90_v6 = vld [vmem:[%s325_s3] sm:$0xff]  ;;  %216 = vmatprep.mubr.msk.bf16.mxu1 %vm227_vm0, %v226_v0  ;;  %v91_v7 = vld [vmem:[%s325_s3 + $0x8] sm:$0xff]  ;;  %13 = vst [vmem:[#allocation2] sm:$0x1] %v12_v29 }
   0x3   :  { %v92_v8 = vld [vmem:[%s325_s3 + $0x10] sm:$0xff]  ;;  %v93_v9 = vld [vmem:[%s325_s3 + $0x18] sm:$0xff]  ;;  %v36_v10 = vpack.c.bf16 %v34_v5, %v33_v3  ;;  %v29_v11 = vld [vmem:[%s326_s0] sm:$0xff]  ;;  %v98_v12 = vpack.c.bf16 %v91_v7, %v90_v6 }
   0x4   :  { %201 = vmatpush3.bf16.msra.mxu0 %v35_v4  ;;  %v99_v13 = vpack.c.bf16 %v93_v9, %v92_v8  ;;  %v30_v14 = vpack.c.bf16 %v29_v11, %v29_v11  ;;  %v94_v15 = vld [vmem:[%s325_s3 + $0x20] sm:$0xff]  ;;  %v95_v16 = vld [vmem:[%s325_s3 + $0x28] sm:$0xff]  ;;  %v96_v18 = vld [vmem:[%s325_s3 + $0x30] sm:$0xff] }
   0x5   :  { %202 = vmatprep.subr.bf16.mxu0 %v226_v0  ;;  %209 = vmatpush3.bf16.msra.mxu1 %v98_v12  ;;  %v100_v17 = vpack.c.bf16 %v95_v16, %v94_v15  ;;  %v97_v19 = vld [vmem:[%s325_s3 + $0x38] sm:$0xff]  ;;  %v185_v21 = vld [vmem:[%s327_s2] ss:$0 sm:$0xff] }
   0x6   :  { %210 = vmatprep.subr.bf16.mxu1 %v226_v0  ;;  %v101_v20 = vpack.c.bf16 %v97_v19, %v96_v18  ;;  %v187_v30 = vld [vmem:[%s329_s4] ss:$0 sm:$0xff] }
   0x7   :  { %v189_v35 = vld [vmem:[%s330_s5] ss:$0 sm:$0xff] }
   0x8   :  { %203 = vmatpush3.bf16.msra.mxu0 %v36_v10 }
   0x9   :  { %211 = vmatpush3.bf16.msra.mxu1 %v99_v13  ;;  %v190_v40 = vld [vmem:[#allocation2] ss:$0 sm:$0xff] }
   0xa   :  { %212 = vmatprep.subr.bf16.mxu1 %v226_v0 }
   0xb   :  { %205 = vmatmul.mubr.msk.bf16.vlgmr.msra.gmra.mrb[0].mxu0 %vm44_vm1, %v30_v14 }
   0xd   :  { %213 = vmatpush3.bf16.msra.mxu1 %v100_v17 }
   0xe   :  { %214 = vmatprep.subr.bf16.mxu1 %v226_v0 }
  0x11   :  { %215 = vmatpush3.bf16.msra.mxu1 %v101_v20 }
  0xde   :  { %v82_v22 = vpop.f32.mrb[0].mxu0 }
  0xdf   :  { %v83_v23 = vadd.f32 %v185_v21, %v82_v22  ;;  %v206_v24 = vpop.f32.mrb[1].mxu0 }
  0xe0   :  { %v85_v25 = vpop.f32.mrb[2].mxu0 }
  0xe1   :  { %v88_v26 = vmax.f32 %v83_v23, 0.0  ;;  %v207_v27 = vpop.f32.mrb[3].mxu0 }
  0xe3   :  { %v89_v28 = vpack.c.bf16 %v88_v26, %v88_v26 }
  0xe5   :  { %217 = vmatmul.mubr.msk.bf16.vlgmr.msra.gmra.mrb[0].mxu1 %vm109_vm2, %v89_v28 }
 0x1b8   :  { %v147_v31 = vpop.f32.mrb[0].mxu1 }
 0x1b9   :  { %v148_v32 = vadd.f32 %v187_v30, %v147_v31  ;;  %v218_v33 = vpop.f32.mrb[1].mxu1 }
 0x1ba   :  { %v150_v34 = vpop.f32.mrb[2].mxu1 }
 0x1bb   :  { %v153_v36 = vmax.f32 %v148_v32, 0.0  ;;  %v219_v37 = vpop.f32.mrb[3].mxu1 }
 0x1bd   :  { %v161_v38 = vmul.f32 %v189_v35, %v153_v36 }
 0x1bf   :  { %v162_v39 = vsel %vm44_vm1, %v161_v38, 0.0 }
 0x1c0   :  { %163 = vadd.xlane.f32.xlu0 %v162_v39 }
 0x24d   :  { %v164_v41 = vpop.xlane.xlu0 %163 }
 0x24e   :  { %v172_v42 = vadd.f32 %v190_v40, %v164_v41 }
 0x250   :  { %v191_v43 = vmul.f32 -1.442695, %v172_v42 }
 0x252   :  { %222 = vpow2.f32 %v191_v43 }
 0x25c   :  { %v223_v44 = vpop.eup %222 }
 0x25d   :  { %v176_v45 = vadd.f32 1.0, %v223_v44 }
 0x25f   :  { %224 = vrcp.f32 %v176_v45 }
 0x269   :  { %v225_v46 = vpop.eup %224 }
 0x26a   :  { %180 = vst.msk [vmem:[%s331_s7] sm:$0xff] %vm179_vm3, %v225_v46 }

</bundles_post_ra>
